<compile_context>
chip_gen: v6e
topology: v6e:2x2x1
jax: 0.10.0
libtpu: 0.0.40
codegen_flags: <defaults>
</compile_context>

<pallas_src>
import functools

import jax
import jax.numpy as jnp
from jax.experimental import pallas as pl
from jax.experimental.pallas import tpu as pltpu


# ----------------------------------------------------------------------------
# Kernel
# ----------------------------------------------------------------------------
def _channel_attention_kernel(x_ref, w1t_ref, w2t_ref, o_ref, *scratch,
                              hw_total, hw_tile, n_hw, inv_hw):
    # x_ref:   (B_blk, C, hw_tile)  native dtype (f32 / bf16)
    # w1t_ref: (C, HID)             native weight dtype
    # w2t_ref: (HID, C)             native weight dtype
    # o_ref:   (B_blk, C)           x dtype
    # scratch: optional (B_blk, C, 128) f32 accumulator (only when n_hw > 1)
    hw_i = pl.program_id(1)

    def lane_partial_sum(x):
        # (B_blk, C, hw_tile) f32 -> (B_blk, C, 128) f32 using only
        # 128-lane-aligned slices + VPU adds (defers the cross-lane XLU reduce).
        s = x[:, :, 0:128]
        for j in range(1, hw_tile // 128):
            s = s + x[:, :, j * 128:(j + 1) * 128]
        return s

    def epilogue(pooled):
        # pooled: (B_blk, C) f32 channel means.  FC -> ReLU -> FC -> sigmoid.
        w1 = w1t_ref[...].astype(jnp.float32)                       # (C, HID)
        h = jnp.dot(pooled, w1, preferred_element_type=jnp.float32)
        h = jnp.maximum(h, 0.0)
        w2 = w2t_ref[...].astype(jnp.float32)                       # (HID, C)
        out = jnp.dot(h, w2, preferred_element_type=jnp.float32)
        o_ref[...] = jax.nn.sigmoid(out).astype(o_ref.dtype)

    if n_hw == 1:
        # Whole reduction held in one resident block: no accumulator carry.
        x = x_ref[...].astype(jnp.float32)
        if hw_tile % 128 == 0:
            pooled = jnp.sum(lane_partial_sum(x), axis=-1) * inv_hw
        else:
            pooled = jnp.sum(x, axis=-1) * inv_hw
        epilogue(pooled)
        return

    acc_ref = scratch[0]                          # (B_blk, C, 128) f32
    has_tail = (hw_total % hw_tile) != 0

    @pl.when(hw_i == 0)
    def _init():
        acc_ref[...] = jnp.zeros_like(acc_ref)

    if has_tail:
        # Interior tiles: plain accumulate.  The masked path only runs on the
        # tail step (folded into the finalize branch below).
        @pl.when(hw_i < n_hw - 1)
        def _interior():
            acc_ref[...] += lane_partial_sum(x_ref[...].astype(jnp.float32))
    else:
        acc_ref[...] += lane_partial_sum(x_ref[...].astype(jnp.float32))

    @pl.when(hw_i == n_hw - 1)
    def _finalize():
        acc = acc_ref[...]
        if has_tail:
            tail_len = hw_total - (n_hw - 1) * hw_tile            # static
            lane = jax.lax.broadcasted_iota(jnp.int32, (1, 1, hw_tile), 2)
            x = jnp.where(lane < tail_len,
                          x_ref[...].astype(jnp.float32), 0.0)    # select, not *
            acc = acc + lane_partial_sum(x)
        pooled = jnp.sum(acc, axis=-1) * inv_hw                   # one XLU reduce
        epilogue(pooled)


# ----------------------------------------------------------------------------
# Tiling / VMEM heuristics
# ----------------------------------------------------------------------------
def _vmem_capacity_bytes():
    try:
        cap = getattr(pltpu.get_tpu_info(), "vmem_capacity_bytes", None)
        if cap:
            return int(cap)
    except Exception:
        pass
    return 64 * 1024 * 1024          # conservative: assume v7x-sized VMEM


def _budgets(vmem_cap):
    """(per-input-buffer budget, scoped-VMEM limit cap) per chip generation."""
    if vmem_cap >= 128 * 1024 * 1024:                   # v5e / v6e
        return 28 * 1024 * 1024, 96 * 1024 * 1024
    return 12 * 1024 * 1024, 44 * 1024 * 1024           # v7x (64 MiB / TC)


def _choose_b_block(b):
    """Batch block: multiple of 8 (sublane rule on the (B_blk, C) output block)
    or the full batch.  Prefer >= 2 blocks so the 'parallel' batch axis can
    feed both v7x TensorCores."""
    if b % 8 != 0:
        return b
    for b_blk in range((b // 16) * 8, 0, -8):           # largest with n_b >= 2
        if b % b_blk == 0:
            return b_blk
    # TODO(synk): for B <= 8 on v7x, split the HW reduction across a leading
    # size-2 "parallel" axis (per-core partial sums + tiny XLA combine).
    return 8


def _choose_hw_tile(hw, b_blk, c, itemsize, per_buffer_budget):
    """HW tile: full extent, or a multiple of 128 with a >=1 KiB contiguous
    run per (b, c) row, sized to the per-buffer VMEM budget."""
    min_tile = max(128, 1024 // itemsize)               # >= 1 KiB DMA runs
    if hw <= min_tile:
        return hw                                        # full extent
    cap = (per_buffer_budget // (b_blk * c * itemsize)) // 128 * 128
    cap = max(min_tile, cap)
    if hw <= cap:
        return hw                                        # single full-HW block
    t = cap
    while t >= min_tile:                                 # prefer exact divisors
        if hw % t == 0:
            return t
        t -= 128
    return cap                                           # kernel masks the tail


# ----------------------------------------------------------------------------
# Wrapper
# ----------------------------------------------------------------------------
def channel_attention(x_nchw, w1, w2, *, hw_tile=None):
    """x_nchw: (B, C, H, W).  w1: (C//r, C), w2: (C, C//r) (nn.Linear layout)."""
    b, c, h, w = x_nchw.shape
    hid = w1.shape[0]
    hw = h * w

    x_flat = x_nchw.reshape(b, c, hw)      # free reshape, native dtype
    w1t = jnp.transpose(w1)                # (C, HID), native dtype
    w2t = jnp.transpose(w2)                # (HID, C), native dtype

    b_blk = _choose_b_block(b)
    buf_budget, limit_cap = _budgets(_vmem_capacity_bytes())
    if hw_tile is None:
        hw_tile = _choose_hw_tile(hw, b_blk, c, x_flat.dtype.itemsize, buf_budget)
    hw_tile = min(hw_tile, hw)
    n_hw = pl.cdiv(hw, hw_tile)
    if n_hw > 1 and hw_tile % 128 != 0:
        raise ValueError("hw_tile must be a multiple of 128 unless it covers "
                         "the full spatial extent")
    n_b = b // b_blk

    kernel = functools.partial(
        _channel_attention_kernel,
        hw_total=hw, hw_tile=hw_tile, n_hw=n_hw, inv_hw=float(1.0 / hw))

    scratch = [] if n_hw == 1 else [pltpu.VMEM((b_blk, c, 128), jnp.float32)]

    def build(buffered_weights):
        w_pipe = dict(pipeline_mode=pl.Buffered(1)) if buffered_weights else {}
        # Scoped-VMEM limit from the actual block byte counts (+headroom).
        needed = (2 * b_blk * c * hw_tile * x_flat.dtype.itemsize           # input
                  + (1 if buffered_weights else 2) * 2 * c * hid * w1t.dtype.itemsize
                  + 2 * b_blk * c * x_nchw.dtype.itemsize                   # output
                  + (0 if n_hw == 1 else b_blk * c * 128 * 4))              # scratch
        vmem_limit = int(min(max(needed * 5 // 4 + (2 << 20), 32 << 20), limit_cap))
        return pl.pallas_call(
            kernel,
            out_shape=jax.ShapeDtypeStruct((b, c), x_nchw.dtype),
            grid_spec=pltpu.PrefetchScalarGridSpec(
                num_scalar_prefetch=0,
                grid=(n_b, n_hw),
                in_specs=[
                    # Input slab: new block every step (auto double-buffered).
                    pl.BlockSpec((b_blk, c, hw_tile), lambda bi, hi: (bi, 0, hi)),
                    # Weights: constant block index -> resident; single buffer.
                    pl.BlockSpec((c, hid), lambda bi, hi: (0, 0), **w_pipe),
                    pl.BlockSpec((hid, c), lambda bi, hi: (0, 0), **w_pipe),
                ],
                # Same output block across the HW axis (accumulator pattern).
                out_specs=pl.BlockSpec((b_blk, c), lambda bi, hi: (bi, 0)),
                scratch_shapes=scratch,
            ),
            compiler_params=pltpu.CompilerParams(
                dimension_semantics=("parallel", "arbitrary"),
                vmem_limit_bytes=vmem_limit,
            ),
        )

    try:
        out = jax.block_until_ready(build(True)(x_flat, w1t, w2t))
    except Exception:
        # pl.Buffered(1) on the weights is a pure VMEM-footprint optimization;
        # fall back to default double-buffered weights if it is rejected.
        out = jax.block_until_ready(build(False)(x_flat, w1t, w2t))

    # view(b, c, 1, 1) in the PyTorch forward.
    return out.reshape(b, c, 1, 1)


def channel_attention_ref(x_nchw, w1, w2):
    """Pure-JAX reference mirroring the PyTorch forward."""
    b, c, _, _ = x_nchw.shape
    pooled = jnp.mean(x_nchw.astype(jnp.float32), axis=(2, 3))     # (B, C)
    h = jnp.maximum(pooled @ w1.astype(jnp.float32).T, 0.0)
    out = jax.nn.sigmoid(h @ w2.astype(jnp.float32).T)
    return out.reshape(b, c, 1, 1).astype(x_nchw.dtype)


if __name__ == "__main__":
    key = jax.random.PRNGKey(0)
    R = 16

    # ---- Test 1: gridded reduction (HW=256 as two 128-wide tiles, no tail). ----
    B, C, H, W = 2, 64, 16, 16
    HID = C // R
    kx, k1, k2, key = jax.random.split(key, 4)
    x = jax.random.normal(kx, (B, C, H, W), dtype=jnp.float32)
    w1 = jax.random.normal(k1, (HID, C), dtype=jnp.float32) * (1.0 / jnp.sqrt(C))
    w2 = jax.random.normal(k2, (C, HID), dtype=jnp.float32) * (1.0 / jnp.sqrt(HID))
    out = jax.block_until_ready(channel_attention(x, w1, w2, hw_tile=128))
    ref = channel_attention_ref(x, w1, w2)
    assert out.shape == (B, C, 1, 1)
    assert jnp.allclose(out, ref, atol=1e-5, rtol=1e-5), "mismatch (test 1)"

    # ---- Test 2: non-dividing HW (masked tail) + batch not multiple of 8. ----
    B2, C2, H2, W2 = 3, 32, 14, 14                 # HW=196, tile=128 -> tail
    HID2 = C2 // R
    kx, k1, k2, key = jax.random.split(key, 4)
    x2 = jax.random.normal(kx, (B2, C2, H2, W2), dtype=jnp.float32)
    w1b = jax.random.normal(k1, (HID2, C2), dtype=jnp.float32) * (1.0 / jnp.sqrt(C2))
    w2b = jax.random.normal(k2, (C2, HID2), dtype=jnp.float32) * (1.0 / jnp.sqrt(HID2))
    out2 = jax.block_until_ready(channel_attention(x2, w1b, w2b, hw_tile=128))
    ref2 = channel_attention_ref(x2, w1b, w2b)
    assert out2.shape == (B2, C2, 1, 1)
    assert jnp.allclose(out2, ref2, atol=1e-5, rtol=1e-5), "mismatch (test 2)"

    # ---- Test 3: bf16 input, auto tile (full-HW single block), B_blk=8/n_b=2. ----
    B3, C3, H3, W3 = 16, 32, 8, 8
    HID3 = C3 // R
    kx, k1, k2, key = jax.random.split(key, 4)
    x3 = jax.random.normal(kx, (B3, C3, H3, W3), dtype=jnp.bfloat16)
    w1c = jax.random.normal(k1, (HID3, C3), dtype=jnp.float32) * (1.0 / jnp.sqrt(C3))
    w2c = jax.random.normal(k2, (C3, HID3), dtype=jnp.float32) * (1.0 / jnp.sqrt(HID3))
    out3 = jax.block_until_ready(channel_attention(x3, w1c, w2c))
    ref3 = channel_attention_ref(x3, w1c, w2c)
    assert out3.shape == (B3, C3, 1, 1)
    assert jnp.allclose(out3.astype(jnp.float32), ref3.astype(jnp.float32),
                        atol=1e-2, rtol=1e-2), "mismatch (test 3)"

    print("KERNEL_OK")
</pallas_src>

<mosaic_0001>
module attributes {stable_mosaic.version = 11 : i64} {
  func.func @_channel_attention_kernel(%arg0: i32, %arg1: i32, %arg2: memref<2x64x128xf32, #tpu.memory_space<vmem>>, %arg3: memref<64x4xf32, #tpu.memory_space<vmem>>, %arg4: memref<4x64xf32, #tpu.memory_space<vmem>>, %arg5: memref<2x64xf32, #tpu.memory_space<vmem>>, %arg6: memref<2x64x128xf32, #tpu.memory_space<vmem>>) attributes {dimension_semantics = [#tpu.dimension_semantics<parallel>, #tpu.dimension_semantics<arbitrary>], iteration_bounds = array<i64: 1, 2>, scalar_prefetch = 0 : i64, scratch_operands = 1 : i64, tpu.core_type = #tpu.core_type<tc>, window_params = [{transform_indices = @transform_0, window_bounds = array<i64: 2, 64, 128>}, {pipeline_mode = #tpu.pipeline_mode<synchronous>, transform_indices = @transform_1, window_bounds = array<i64: 64, 4>}, {pipeline_mode = #tpu.pipeline_mode<synchronous>, transform_indices = @transform_2, window_bounds = array<i64: 4, 64>}, {transform_indices = @transform_3, window_bounds = array<i64: 2, 64>}]} {
    %c0_i32 = arith.constant 0 : i32
    %0 = arith.cmpi eq, %arg1, %c0_i32 : i32
    %1 = arith.extui %0 : i1 to i32
    %c0_i32_0 = arith.constant 0 : i32
    %2 = arith.cmpi ne, %1, %c0_i32_0 : i32
    scf.if %2 {
      %cst = arith.constant 0.000000e+00 : f32
      %10 = vector.broadcast %cst : f32 to vector<2x64x128xf32>
      %c0_10 = arith.constant 0 : index
      %c0_11 = arith.constant 0 : index
      %c0_12 = arith.constant 0 : index
      %11 = vector.load %arg6[%c0_10, %c0_11, %c0_12] : memref<2x64x128xf32, #tpu.memory_space<vmem>>, vector<2x64x128xf32>
      tpu.vector_store %arg6[%c0_10, %c0_11, %c0_12], %10 {strides = array<i32>} : memref<2x64x128xf32, #tpu.memory_space<vmem>>, vector<2x64x128xf32>,
    } else {
    }
    %c0 = arith.constant 0 : index
    %c0_1 = arith.constant 0 : index
    %c0_2 = arith.constant 0 : index
    %3 = vector.load %arg6[%c0, %c0_1, %c0_2] : memref<2x64x128xf32, #tpu.memory_space<vmem>>, vector<2x64x128xf32>
    %c0_3 = arith.constant 0 : index
    %c0_4 = arith.constant 0 : index
    %c0_5 = arith.constant 0 : index
    %4 = vector.load %arg2[%c0_3, %c0_4, %c0_5] : memref<2x64x128xf32, #tpu.memory_space<vmem>>, vector<2x64x128xf32>
    %5 = arith.addf %3, %4 : vector<2x64x128xf32>
    %c0_6 = arith.constant 0 : index
    %c0_7 = arith.constant 0 : index
    %c0_8 = arith.constant 0 : index
    %6 = vector.load %arg6[%c0_6, %c0_7, %c0_8] : memref<2x64x128xf32, #tpu.memory_space<vmem>>, vector<2x64x128xf32>
    tpu.vector_store %arg6[%c0_6, %c0_7, %c0_8], %5 {strides = array<i32>} : memref<2x64x128xf32, #tpu.memory_space<vmem>>, vector<2x64x128xf32>,
    %c1_i32 = arith.constant 1 : i32
    %7 = arith.cmpi eq, %arg1, %c1_i32 : i32
    %8 = arith.extui %7 : i1 to i32
    %c0_i32_9 = arith.constant 0 : i32
    %9 = arith.cmpi ne, %8, %c0_i32_9 : i32
    scf.if %9 {
      %c0_10 = arith.constant 0 : index
      %c0_11 = arith.constant 0 : index
      %c0_12 = arith.constant 0 : index
      %10 = vector.load %arg6[%c0_10, %c0_11, %c0_12] : memref<2x64x128xf32, #tpu.memory_space<vmem>>, vector<2x64x128xf32>
      %cst = arith.constant dense<0.000000e+00> : vector<2x64xf32>
      %11 = vector.multi_reduction <add>, %10, %cst [2] : vector<2x64x128xf32> to vector<2x64xf32>
      %cst_13 = arith.constant 3.906250e-03 : f32
      %12 = vector.broadcast %cst_13 : f32 to vector<2x64xf32>
      %13 = arith.mulf %11, %12 : vector<2x64xf32>
      %c0_14 = arith.constant 0 : index
      %c0_15 = arith.constant 0 : index
      %14 = vector.load %arg3[%c0_14, %c0_15] : memref<64x4xf32, #tpu.memory_space<vmem>>, vector<64x4xf32>
      %cst_16 = arith.constant dense<0.000000e+00> : vector<2x4xf32>
      %15 = tpu.matmul %13, %14, %cst_16 {dimension_numbers = #tpu.dot_dimension_numbers<[1], [0], [0], [1], [0, 0, 1, 1], [], []>} : vector<2x64xf32>, vector<64x4xf32>, vector<2x4xf32> -> vector<2x4xf32>
      %cst_17 = arith.constant 0.000000e+00 : f32
      %16 = vector.broadcast %cst_17 : f32 to vector<2x4xf32>
      %17 = arith.maximumf %15, %16 : vector<2x4xf32>
      %c0_18 = arith.constant 0 : index
      %c0_19 = arith.constant 0 : index
      %18 = vector.load %arg4[%c0_18, %c0_19] : memref<4x64xf32, #tpu.memory_space<vmem>>, vector<4x64xf32>
      %cst_20 = arith.constant dense<0.000000e+00> : vector<2x64xf32>
      %19 = tpu.matmul %17, %18, %cst_20 {dimension_numbers = #tpu.dot_dimension_numbers<[1], [0], [0], [1], [0, 0, 1, 1], [], []>} : vector<2x4xf32>, vector<4x64xf32>, vector<2x64xf32> -> vector<2x64xf32>
      %20 = arith.negf %19 : vector<2x64xf32>
      %21 = math.exp %20 : vector<2x64xf32>
      %cst_21 = arith.constant 1.000000e+00 : f32
      %22 = vector.broadcast %cst_21 : f32 to vector<2x64xf32>
      %23 = arith.addf %22, %21 : vector<2x64xf32>
      %24 = arith.divf %22, %23 : vector<2x64xf32>
      %c0_22 = arith.constant 0 : index
      %c0_23 = arith.constant 0 : index
      %25 = vector.load %arg5[%c0_22, %c0_23] : memref<2x64xf32, #tpu.memory_space<vmem>>, vector<2x64xf32>
      tpu.vector_store %arg5[%c0_22, %c0_23], %24 {strides = array<i32>} : memref<2x64xf32, #tpu.memory_space<vmem>>, vector<2x64xf32>,
    } else {
    }
    return
  }
  func.func @transform_0(%arg0: i32, %arg1: i32) -> (i32, i32, i32) {
    %c0_i32 = arith.constant 0 : i32
    %c0_i32_0 = arith.constant 0 : i32
    return %arg0, %c0_i32, %arg1 : i32, i32, i32
  }
  func.func @transform_1(%arg0: i32, %arg1: i32) -> (i32, i32) {
    %c0_i32 = arith.constant 0 : i32
    %c0_i32_0 = arith.constant 0 : i32
    %c0_i32_1 = arith.constant 0 : i32
    return %c0_i32, %c0_i32_0 : i32, i32
  }
  func.func @transform_2(%arg0: i32, %arg1: i32) -> (i32, i32) {
    %c0_i32 = arith.constant 0 : i32
    %c0_i32_0 = arith.constant 0 : i32
    %c0_i32_1 = arith.constant 0 : i32
    return %c0_i32, %c0_i32_0 : i32, i32
  }
  func.func @transform_3(%arg0: i32, %arg1: i32) -> (i32, i32) {
    %c0_i32 = arith.constant 0 : i32
    %c0_i32_0 = arith.constant 0 : i32
    return %arg0, %c0_i32 : i32, i32
  }
}

module attributes {stable_mosaic.version = 11 : i64} {
  func.func @_channel_attention_kernel(%arg0: i32, %arg1: i32, %arg2: memref<2x64x128xf32, #tpu.memory_space<vmem>>, %arg3: memref<64x4xf32, #tpu.memory_space<vmem>>, %arg4: memref<4x64xf32, #tpu.memory_space<vmem>>, %arg5: memref<2x64xf32, #tpu.memory_space<vmem>>, %arg6: memref<2x64x128xf32, #tpu.memory_space<vmem>>) attributes {dimension_semantics = [#tpu.dimension_semantics<parallel>, #tpu.dimension_semantics<arbitrary>], iteration_bounds = array<i64: 1, 2>, scalar_prefetch = 0 : i64, scratch_operands = 1 : i64, tpu.core_type = #tpu.core_type<tc>, window_params = [{transform_indices = @transform_0, window_bounds = array<i64: 2, 64, 128>}, {pipeline_mode = #tpu.pipeline_mode<synchronous>, transform_indices = @transform_1, window_bounds = array<i64: 64, 4>}, {pipeline_mode = #tpu.pipeline_mode<synchronous>, transform_indices = @transform_2, window_bounds = array<i64: 4, 64>}, {transform_indices = @transform_3, window_bounds = array<i64: 2, 64>}]} {
    %c0_i32 = arith.constant 0 : i32
    %0 = arith.cmpi eq, %arg1, %c0_i32 : i32
    %1 = arith.extui %0 : i1 to i32
    %c0_i32_0 = arith.constant 0 : i32
    %2 = arith.cmpi ne, %1, %c0_i32_0 : i32
    scf.if %2 {
      %cst = arith.constant 0.000000e+00 : f32
      %10 = vector.broadcast %cst : f32 to vector<2x64x128xf32>
      %c0_10 = arith.constant 0 : index
      %c0_11 = arith.constant 0 : index
      %c0_12 = arith.constant 0 : index
      %11 = vector.load %arg6[%c0_10, %c0_11, %c0_12] : memref<2x64x128xf32, #tpu.memory_space<vmem>>, vector<2x64x128xf32>
      tpu.vector_store %arg6[%c0_10, %c0_11, %c0_12], %10 {strides = array<i32>} : memref<2x64x128xf32, #tpu.memory_space<vmem>>, vector<2x64x128xf32>,
    } else {
    }
    %c0 = arith.constant 0 : index
    %c0_1 = arith.constant 0 : index
    %c0_2 = arith.constant 0 : index
    %3 = vector.load %arg6[%c0, %c0_1, %c0_2] : memref<2x64x128xf32, #tpu.memory_space<vmem>>, vector<2x64x128xf32>
    %c0_3 = arith.constant 0 : index
    %c0_4 = arith.constant 0 : index
    %c0_5 = arith.constant 0 : index
    %4 = vector.load %arg2[%c0_3, %c0_4, %c0_5] : memref<2x64x128xf32, #tpu.memory_space<vmem>>, vector<2x64x128xf32>
    %5 = arith.addf %3, %4 : vector<2x64x128xf32>
    %c0_6 = arith.constant 0 : index
    %c0_7 = arith.constant 0 : index
    %c0_8 = arith.constant 0 : index
    %6 = vector.load %arg6[%c0_6, %c0_7, %c0_8] : memref<2x64x128xf32, #tpu.memory_space<vmem>>, vector<2x64x128xf32>
    tpu.vector_store %arg6[%c0_6, %c0_7, %c0_8], %5 {strides = array<i32>} : memref<2x64x128xf32, #tpu.memory_space<vmem>>, vector<2x64x128xf32>,
    %c1_i32 = arith.constant 1 : i32
    %7 = arith.cmpi eq, %arg1, %c1_i32 : i32
    %8 = arith.extui %7 : i1 to i32
    %c0_i32_9 = arith.constant 0 : i32
    %9 = arith.cmpi ne, %8, %c0_i32_9 : i32
    scf.if %9 {
      %c0_10 = arith.constant 0 : index
      %c0_11 = arith.constant 0 : index
      %c0_12 = arith.constant 0 : index
      %10 = vector.load %arg6[%c0_10, %c0_11, %c0_12] : memref<2x64x128xf32, #tpu.memory_space<vmem>>, vector<2x64x128xf32>
      %cst = arith.constant dense<0.000000e+00> : vector<2x64xf32>
      %11 = vector.multi_reduction <add>, %10, %cst [2] : vector<2x64x128xf32> to vector<2x64xf32>
      %cst_13 = arith.constant 3.906250e-03 : f32
      %12 = vector.broadcast %cst_13 : f32 to vector<2x64xf32>
      %13 = arith.mulf %11, %12 : vector<2x64xf32>
      %c0_14 = arith.constant 0 : index
      %c0_15 = arith.constant 0 : index
      %14 = vector.load %arg3[%c0_14, %c0_15] : memref<64x4xf32, #tpu.memory_space<vmem>>, vector<64x4xf32>
      %cst_16 = arith.constant dense<0.000000e+00> : vector<2x4xf32>
      %15 = tpu.matmul %13, %14, %cst_16 {dimension_numbers = #tpu.dot_dimension_numbers<[1], [0], [0], [1], [0, 0, 1, 1], [], []>} : vector<2x64xf32>, vector<64x4xf32>, vector<2x4xf32> -> vector<2x4xf32>
      %cst_17 = arith.constant 0.000000e+00 : f32
      %16 = vector.broadcast %cst_17 : f32 to vector<2x4xf32>
      %17 = arith.maximumf %15, %16 : vector<2x4xf32>
      %c0_18 = arith.constant 0 : index
      %c0_19 = arith.constant 0 : index
      %18 = vector.load %arg4[%c0_18, %c0_19] : memref<4x64xf32, #tpu.memory_space<vmem>>, vector<4x64xf32>
      %cst_20 = arith.constant dense<0.000000e+00> : vector<2x64xf32>
      %19 = tpu.matmul %17, %18, %cst_20 {dimension_numbers = #tpu.dot_dimension_numbers<[1], [0], [0], [1], [0, 0, 1, 1], [], []>} : vector<2x4xf32>, vector<4x64xf32>, vector<2x64xf32> -> vector<2x64xf32>
      %20 = arith.negf %19 : vector<2x64xf32>
      %21 = math.exp %20 : vector<2x64xf32>
      %cst_21 = arith.constant 1.000000e+00 : f32
      %22 = vector.broadcast %cst_21 : f32 to vector<2x64xf32>
      %23 = arith.addf %22, %21 : vector<2x64xf32>
      %24 = arith.divf %22, %23 : vector<2x64xf32>
      %c0_22 = arith.constant 0 : index
      %c0_23 = arith.constant 0 : index
      %25 = vector.load %arg5[%c0_22, %c0_23] : memref<2x64xf32, #tpu.memory_space<vmem>>, vector<2x64xf32>
      tpu.vector_store %arg5[%c0_22, %c0_23], %24 {strides = array<i32>} : memref<2x64xf32, #tpu.memory_space<vmem>>, vector<2x64xf32>,
    } else {
    }
    return
  }
  func.func @transform_0(%arg0: i32, %arg1: i32) -> (i32, i32, i32) {
    %c0_i32 = arith.constant 0 : i32
    %c0_i32_0 = arith.constant 0 : i32
    return %arg0, %c0_i32, %arg1 : i32, i32, i32
  }
  func.func @transform_1(%arg0: i32, %arg1: i32) -> (i32, i32) {
    %c0_i32 = arith.constant 0 : i32
    %c0_i32_0 = arith.constant 0 : i32
    %c0_i32_1 = arith.constant 0 : i32
    return %c0_i32, %c0_i32_0 : i32, i32
  }
  func.func @transform_2(%arg0: i32, %arg1: i32) -> (i32, i32) {
    %c0_i32 = arith.constant 0 : i32
    %c0_i32_0 = arith.constant 0 : i32
    %c0_i32_1 = arith.constant 0 : i32
    return %c0_i32, %c0_i32_0 : i32, i32
  }
  func.func @transform_3(%arg0: i32, %arg1: i32) -> (i32, i32) {
    %c0_i32 = arith.constant 0 : i32
    %c0_i32_0 = arith.constant 0 : i32
    return %arg0, %c0_i32 : i32, i32
  }
}

</mosaic_0001>

<bundles_post_ra>
// kernel: tpu_custom_call.1
= control target key start
LH: loop header
LB: loop body
LE: loop exit
PB: predicated region body
PF: predicated region fallthrough
CT: control target
= control target key end

     0   :  { %8 = vsyncpa [#allocation4], 0  ;;  %s1135_s0 = inlined_call_operand.hbm [shape: f32[2,64,256], index: 0, kind: input, shape index: {}]   ;;  %s1136_s1 = inlined_call_operand.vmem [shape: f32[64,4], index: 1, kind: input, shape index: {}]   ;;  %s1137_s2 = inlined_call_operand.vmem [shape: f32[4,64], index: 2, kind: input, shape index: {}]   ;;  %s1138_s3 = inlined_call_operand.hbm [shape: f32[2,64], index: 3, kind: output, shape index: {}]  }
   0x1   :  { %10 = vsyncpa [#allocation4 + $0x1], 0 }
   0x2   :  { %11 = vsyncpa [#allocation5], 0  ;;  %s964_s12 = smov 0   ;;  %s966_s13 = smov 0  }
   0x3   :  { %s968_s14 = smov 0   ;;  %s970_s15 = smov 0  }
   0x4   :  { %s972_s16 = smov 0   ;;  %s974_s17 = smov 0  }
   0x5 LB: > { %s704_s18 = sadd.s32 4294967295, %s934_s17   ;;  %s26_s19 = sadd.s32 1, %s930_s16  ;;  %s934_s17 = sphi %s974_s17, %s17_s17   ;;  %s930_s16 = sphi %s972_s16, %s1147_s16   ;;  %s926_s15 = sphi %s970_s15, %s1146_s15   ;;  %s922_s14 = sphi %s968_s14, %s1145_s14   ;;  %s918_s13 = sphi %s966_s13, %s1144_s13   ;;  %s914_s12 = sphi %s964_s12, %s1143_s12  }
   0x6   : > { %p27_p0 = scmp.ge.s32.totalorder %s26_s19, 2  ;;  %s38_s20 = sadd.s32 1, %s922_s14 }
   0x7   : > { %p45_p1 = scmp.ne.s32.totalorder %s922_s14, %s918_s13  ;;  %p46_p2 = scmp.eq.s32.totalorder %s934_s17, 0 }
   0x8   : > { %s1149_s19 = smov (%p27_p0, %s26_s19), 0  ;;  %p51_p4 = scmp.ne.s32.totalorder %s918_s13, %s914_s12 }
   0x9   : > { %p1000_p3 = por %p46_p2, %p45_p1  ;;  %s34_s22 = ssub.s32 %s930_s16, %s1149_s19 }
   0xa   : > { %p52_p5 = scmp.eq.s32.totalorder %s704_s18, 0  ;;  %p36_p6 = scmp.eq.s32.totalorder %s34_s22, 0 }
   0xb   : > { %p766_p8 = scmp.lt.s32.totalorder %s934_s17, 2  ;;  %s149_s25 = sand.u32 1, %s922_s14  }
   0xc   : > { %p1009_p7 = por %p52_p5, %p51_p4  ;;  %s708_s26 = sshll.u32 %s930_s16, 7 }
   0xd   : > { %s1015_s24 = scalar_select %p36_p6, %s922_s14, %s38_s20  }
   0xe   : > { %s707_s27 = sshll.u32 %s149_s25, 7  ;;  %s161_s30 = scalar_lea.hbm %s1135_s0, %s708_s26 }
   0xf   : > { %s153_s4 = scalar_lea.vmem [#allocation3], %s707_s27  ;;  %p1024_p9 = pnand %p766_p8, %p1000_p3 }
  0x10   : > { %s162_s5 = sshll.u32 %s153_s4, 4  ;;  %p709_p10 = scmp.ge.s32.totalorder %s934_s17, 1  ;;  %s163_s5 = int_to_ptr.vmem [resolvable:$true] %s162_s5 }
  0x11   : > { %s150_s7 = scalar_lea.sflag [#allocation4], %s149_s25  ;;  %p830_p11 = pneg %p1024_p9 }
  0x12   : > { %s841_s8 = scalar_lea.vmem %s163_s5, 2048  ;;  %s936_s9 = smov [#allocation3]  }
  0x13   : > { %p842_p12 = scmp.ne.s32.totalorder %s163_s5, %s841_s8  ;;  %s846_s10 = sshll.u32 %s936_s9, 4  ;;  %s847_s10 = int_to_ptr.vmem [resolvable:$false] %s846_s10 }
  0x14   : > { %s848_s11 = scalar_lea.vmem %s847_s10, 4096  ;;  %p849_p1 = scmp.lt.s32.totalorder %s163_s5, %s847_s10 }
  0x15   : > { %p844_p13 = pnand %p842_p12, %p830_p11  ;;  %p850_p2 = scmp.lt.s32.totalorder %s848_s11, %s841_s8 }
  0x17   : > { %p845_p0 = pneg %p844_p13  ;;  %p851_p3 = por %p850_p2, %p849_p1 }
  0x19   : > { %p852_p4 = pnand %p851_p3, %p845_p0 }
  0x1b   : > { %855 = shalt.err (!%p852_p4)
}
  0x1c   : > { %s937_s12 = smov 256   ;;  %s938_s20 = smov 128  }
  0x1d   : > { %s939_s21 = smov 8   ;;  %p170_p5 = scmp.lt.s32.totalorder %s934_s17, 3 }
  0x1e   : > { %765 = dma.hbm_to_vmem [thread:$0]  (!%p1024_p9), %s161_s30, 2048, %s163_s5, %s150_s7, %s937_s12, %s938_s20, %s939_s21  }
  0x1f   : > { %p171_p6 = pnand %p709_p10, %p170_p5 }
  0x20   : > { %s176_s22 = sand.u32 (!%p171_p6), 1, %s918_s13  }
  0x21   : > { %174 = sbr.rel (%p171_p6) target bundleno = 680 (0x2a8), region = 32  ;;  %s710_s25 = sshll.u32 (!%p171_p6), %s176_s22, 7 }
  0x22   : > { %s177_s26 = scalar_lea.sflag (!%p171_p6), [#allocation4], %s176_s22  ;;  %s1037_s27 = scalar_lea.vmem (!%p171_p6), [#allocation3], %s710_s25 }
  0x26   : > { %905 = dma.done.wait (%p1009_p7), %s177_s26, 2048  }
  0x27   : > { %907 = vsyncadd (%p1009_p7), %s177_s26, 4294965248  ;;  %p711_p8 = scmp.ne.s32.totalorder %s926_s15, 0 }
  0x29   : > { %202 = sbr.rel (%p711_p8) target bundleno = 55 (0x37), region = 40 }
  0x2e   : > { %v940_v0 = vmov 0.0  }
  0x2f   : > { %203 = vst [vmem:[#allocation2 + $0x30] sm:$0xff] %v940_v0  ;;  %204 = vst [vmem:[#allocation2] sm:$0xff] %v940_v0 }
  0x30   : > { %205 = vst [vmem:[#allocation2 + $0x58] sm:$0xff] %v940_v0  ;;  %206 = vst [vmem:[#allocation2 + $0x18] sm:$0xff] %v940_v0 }
  0x31   : > { %207 = vst [vmem:[#allocation2 + $0x50] sm:$0xff] %v940_v0  ;;  %208 = vst [vmem:[#allocation2 + $0x68] sm:$0xff] %v940_v0 }
  0x32   : > { %209 = vst [vmem:[#allocation2 + $0x8] sm:$0xff] %v940_v0  ;;  %210 = vst [vmem:[#allocation2 + $0x48] sm:$0xff] %v940_v0 }
  0x33   : > { %211 = vst [vmem:[#allocation2 + $0x40] sm:$0xff] %v940_v0  ;;  %212 = vst [vmem:[#allocation2 + $0x20] sm:$0xff] %v940_v0 }
  0x34   : > { %213 = vst [vmem:[#allocation2 + $0x10] sm:$0xff] %v940_v0  ;;  %214 = vst [vmem:[#allocation2 + $0x38] sm:$0xff] %v940_v0 }
  0x35   : > { %215 = vst [vmem:[#allocation2 + $0x60] sm:$0xff] %v940_v0  ;;  %216 = vst [vmem:[#allocation2 + $0x70] sm:$0xff] %v940_v0 }
  0x36   : > { %217 = vst [vmem:[#allocation2 + $0x78] sm:$0xff] %v940_v0  ;;  %218 = vst [vmem:[#allocation2 + $0x28] sm:$0xff] %v940_v0 }
  0x37 PF: > { %v219_v1 = vld [vmem:[#allocation2 + $0x30] sm:$0xff]  ;;  %v235_v2 = vld [vmem:[%s1037_s27] sm:$0xff]  ;;  %v236_v5 = vld [vmem:[%s1037_s27 + $0x8] sm:$0xff]  ;;  %p712_p7 = scmp.ne.s32.totalorder %s926_s15, 1 }
  0x38   : > { %v220_v3 = vld [vmem:[#allocation2] sm:$0xff]  ;;  %v251_v4 = vadd.f32 %v235_v2, %v219_v1  ;;  %v221_v6 = vld [vmem:[#allocation2 + $0x58] sm:$0xff]  ;;  %v237_v7 = vld [vmem:[%s1037_s27 + $0x10] sm:$0xff] }
  0x39   : > { %v252_v8 = vadd.f32 %v236_v5, %v220_v3  ;;  %v253_v9 = vadd.f32 %v237_v7, %v221_v6  ;;  %v222_v10 = vld [vmem:[#allocation2 + $0x18] sm:$0xff]  ;;  %v223_v12 = vld [vmem:[#allocation2 + $0x50] sm:$0xff]  ;;  %v239_v14 = vld [vmem:[%s1037_s27 + $0x20] sm:$0xff] }
  0x3a   : > { %v238_v11 = vld [vmem:[%s1037_s27 + $0x18] sm:$0xff]  ;;  %267 = vst [vmem:[#allocation2 + $0x30] sm:$0xff] %v251_v4  ;;  %v224_v15 = vld [vmem:[#allocation2 + $0x68] sm:$0xff]  ;;  %v255_v17 = vadd.f32 %v239_v14, %v223_v12  ;;  %v241_v20 = vld [vmem:[%s1037_s27 + $0x30] sm:$0xff] }
  0x3b   : > { %v254_v13 = vadd.f32 %v238_v11, %v222_v10  ;;  %v240_v16 = vld [vmem:[%s1037_s27 + $0x28] sm:$0xff]  ;;  %268 = vst [vmem:[#allocation2] sm:$0xff] %v252_v8  ;;  %269 = vst [vmem:[#allocation2 + $0x58] sm:$0xff] %v253_v9  ;;  %v242_v23 = vld [vmem:[%s1037_s27 + $0x38] sm:$0xff] }
  0x3c   : > { %v256_v18 = vadd.f32 %v240_v16, %v224_v15  ;;  %v225_v19 = vld [vmem:[#allocation2 + $0x8] sm:$0xff]  ;;  %v227_v24 = vld [vmem:[#allocation2 + $0x40] sm:$0xff]  ;;  %271 = vst [vmem:[#allocation2 + $0x50] sm:$0xff] %v255_v17  ;;  %v229_v30 = vld [vmem:[#allocation2 + $0x10] sm:$0xff] }
  0x3d   : > { %v226_v21 = vld [vmem:[#allocation2 + $0x48] sm:$0xff]  ;;  %270 = vst [vmem:[#allocation2 + $0x18] sm:$0xff] %v254_v13  ;;  %v257_v22 = vadd.f32 %v241_v20, %v225_v19  ;;  %v243_v25 = vld [vmem:[%s1037_s27 + $0x40] sm:$0xff]  ;;  %v245_v32 = vld [vmem:[%s1037_s27 + $0x50] sm:$0xff] }
  0x3e   : > { %272 = vst [vmem:[#allocation2 + $0x68] sm:$0xff] %v256_v18  ;;  %v258_v26 = vadd.f32 %v242_v23, %v226_v21  ;;  %v259_v27 = vadd.f32 %v243_v25, %v227_v24  ;;  %v228_v28 = vld [vmem:[#allocation2 + $0x20] sm:$0xff]  ;;  %v244_v29 = vld [vmem:[%s1037_s27 + $0x48] sm:$0xff]  ;;  %v230_v33 = vld [vmem:[#allocation2 + $0x38] sm:$0xff]  ;;  %v261_v35 = vadd.f32 %v245_v32, %v229_v30 }
  0x3f   : > { %273 = vst [vmem:[#allocation2 + $0x8] sm:$0xff] %v257_v22  ;;  %v260_v31 = vadd.f32 %v244_v29, %v228_v28  ;;  %v246_v34 = vld [vmem:[%s1037_s27 + $0x58] sm:$0xff]  ;;  %v231_v37 = vld [vmem:[#allocation2 + $0x60] sm:$0xff]  ;;  %v232_v39 = vld [vmem:[#allocation2 + $0x70] sm:$0xff] }
  0x40   : > { %274 = vst [vmem:[#allocation2 + $0x48] sm:$0xff] %v258_v26  ;;  %275 = vst [vmem:[#allocation2 + $0x40] sm:$0xff] %v259_v27  ;;  %v262_v36 = vadd.f32 %v246_v34, %v230_v33  ;;  %v247_v38 = vld [vmem:[%s1037_s27 + $0x60] sm:$0xff]  ;;  %v248_v41 = vld [vmem:[%s1037_s27 + $0x68] sm:$0xff] }
  0x41   : > { %276 = vst [vmem:[#allocation2 + $0x20] sm:$0xff] %v260_v31  ;;  %v263_v40 = vadd.f32 %v247_v38, %v231_v37  ;;  %v233_v42 = vld [vmem:[#allocation2 + $0x78] sm:$0xff]  ;;  %v249_v43 = vld [vmem:[%s1037_s27 + $0x70] sm:$0xff]  ;;  %277 = vst [vmem:[#allocation2 + $0x10] sm:$0xff] %v261_v35  ;;  %v264_v44 = vadd.f32 %v248_v41, %v232_v39  ;;  %286 = sbr.rel (%p712_p7) target bundleno = 665 (0x299), region = 44 }
  0x42   : > { %278 = vst [vmem:[#allocation2 + $0x38] sm:$0xff] %v262_v36  ;;  %v265_v45 = vadd.f32 %v249_v43, %v233_v42  ;;  %v234_v46 = vld [vmem:[#allocation2 + $0x28] sm:$0xff]  ;;  %v250_v47 = vld [vmem:[%s1037_s27 + $0x78] sm:$0xff] }
  0x43   : > { %279 = vst [vmem:[#allocation2 + $0x60] sm:$0xff] %v263_v40  ;;  %v266_v48 = vadd.f32 %v250_v47, %v234_v46  ;;  %280 = vst [vmem:[#allocation2 + $0x70] sm:$0xff] %v264_v44 }
  0x44   : > { %281 = vst [vmem:[#allocation2 + $0x78] sm:$0xff] %v265_v45 }
  0x45   : > { %282 = vst [vmem:[#allocation2 + $0x28] sm:$0xff] %v266_v48 }
  0x46   : > { %v287_v50 = vld [vmem:[#allocation2 + $0x30] sm:$0xff]  ;;  %v288_v52 = vld [vmem:[#allocation2] sm:$0xff]  ;;  %v289_v54 = vld [vmem:[#allocation2 + $0x58] sm:$0xff]  ;;  %v941_v2 = vmov 0.0   ;;  %vm942_vm0 = vmmov 0   ;;  %v375_v14 = vlaneseq  ;;  %vm386_vm1 = vcmask 130112  }
  0x47   : > { %v295_v49 = vld [vmem:[#allocation2 + $0x40] sm:$0xff]  ;;  %303 = vadd.xlane.f32.xlu0 %v287_v50  ;;  %v290_v56 = vld [vmem:[#allocation2 + $0x18] sm:$0xff]  ;;  %v291_v58 = vld [vmem:[#allocation2 + $0x50] sm:$0xff]  ;;  %732 = vmatprep.subr.mxu0 %v941_v2  ;;  %vm393_vm2 = vcmask 195712   ;;  %vm400_vm3 = vcmask 261312   ;;  %vm407_vm4 = vcmask 326912  }
  0x48   : > { %319 = vadd.xlane.f32.xlu1 %v295_v49  ;;  %v296_v51 = vld [vmem:[#allocation2 + $0x20] sm:$0xff]  ;;  %v297_v53 = vld [vmem:[#allocation2 + $0x10] sm:$0xff]  ;;  %v292_v60 = vld [vmem:[#allocation2 + $0x68] sm:$0xff]  ;;  %751 = vmatprep.subr.mxu1 %v941_v2  ;;  %v376_v17 = vand.u32 127, %v375_v14  ;;  %v378_v18 = vshrl.u32 %v375_v14, 7  ;;  %vm414_vm5 = vcmask 392512  }
  0x49   : > { %v298_v55 = vld [vmem:[#allocation2 + $0x38] sm:$0xff]  ;;  %v293_v62 = vld [vmem:[#allocation2 + $0x8] sm:$0xff]  ;;  %v357_v3 = vld [vmem:[%s1136_s1 + $0x30] sm:$0xff]  ;;  %748 = vmatprep.mubr.msk.f32.mxu0 %vm942_vm0, %v941_v2  ;;  %753 = vmatprep.mubr.msk.f32.mxu1 %vm942_vm0, %v941_v2  ;;  %vm421_vm6 = vcmask 458112   ;;  %vm428_vm7 = vcmask 523712   ;;  %vm469_vm8 = vcmask 1041409  }
  0x4a   : > { %v299_v57 = vld [vmem:[#allocation2 + $0x60] sm:$0xff]  ;;  %v300_v59 = vld [vmem:[#allocation2 + $0x70] sm:$0xff]  ;;  %v294_v0 = vld [vmem:[#allocation2 + $0x48] sm:$0xff]  ;;  %v381_v21 = vadd.s32 4294967288, %v376_v17  ;;  %v388_v22 = vadd.s32 4294967280, %v376_v17  ;;  %v395_v23 = vadd.s32 4294967272, %v376_v17  ;;  %v379_v25 = vsub.s32 %v376_v17, %v378_v18 }
  0x4b   : > { %305 = vadd.xlane.f32.xlu0 %v288_v52  ;;  %v301_v61 = vld [vmem:[#allocation2 + $0x78] sm:$0xff]  ;;  %v356_v4 = vld [vmem:[%s1136_s1 + $0x28] sm:$0xff]  ;;  %v355_v5 = vld [vmem:[%s1136_s1 + $0x20] sm:$0xff]  ;;  %v402_v24 = vadd.s32 4294967264, %v376_v17  ;;  %v409_v30 = vadd.s32 4294967256, %v376_v17  ;;  %v416_v32 = vadd.s32 4294967248, %v376_v17 }
  0x4c   : > { %321 = vadd.xlane.f32.xlu1 %v296_v51  ;;  %v302_v63 = vld [vmem:[#allocation2 + $0x28] sm:$0xff]  ;;  %v358_v1 = vld [vmem:[%s1136_s1 + $0x38] sm:$0xff]  ;;  %v353_v7 = vld [vmem:[%s1136_s1 + $0x10] sm:$0xff]  ;;  %v384_v28 = vsub.s32 %v381_v21, %v378_v18  ;;  %v391_v29 = vsub.s32 %v388_v22, %v378_v18  ;;  %v398_v31 = vsub.s32 %v395_v23, %v378_v18  ;;  %v423_v48 = vadd.s32 4294967240, %v376_v17 }
  0x4d   : > { %733 = vmatpush3.msra.mxu0 %v358_v1  ;;  %v354_v6 = vld [vmem:[%s1136_s1 + $0x18] sm:$0xff]  ;;  %v352_v8 = vld [vmem:[%s1136_s1 + $0x8] sm:$0xff]  ;;  %v351_v9 = vld [vmem:[%s1136_s1] sm:$0xff]  ;;  %v405_v35 = vsub.s32 %v402_v24, %v378_v18  ;;  %v412_v44 = vsub.s32 %v409_v30, %v378_v18  ;;  %v419_v47 = vsub.s32 %v416_v32, %v378_v18  ;;  %vm471_vm9 = vcmask 523264  }
  0x4e   : > { %734 = vmatprep.subr.mxu0 %v941_v2  ;;  %v426_v1 = vsub.s32 %v423_v48, %v378_v18  ;;  %vm550_vm10 = vcmask 1043456   ;;  %vm546_vm11 = vcmask 31744   ;;  %vm630_vm12 = vcmask 517120  }
  0x4f   : > { %307 = vadd.xlane.f32.xlu0 %v289_v54  ;;  %735 = vmatpush3.msra.mxu0 %v357_v3 }
  0x50   : > { %323 = vadd.xlane.f32.xlu1 %v297_v53  ;;  %736 = vmatprep.subr.mxu0 %v941_v2 }
  0x51   : > { %737 = vmatpush3.msra.mxu0 %v356_v4 }
  0x52   : > { %738 = vmatprep.subr.mxu0 %v941_v2 }
  0x53   : > { %309 = vadd.xlane.f32.xlu0 %v290_v56  ;;  %739 = vmatpush3.msra.mxu0 %v355_v5 }
  0x54   : > { %325 = vadd.xlane.f32.xlu1 %v298_v55  ;;  %740 = vmatprep.subr.mxu0 %v941_v2 }
  0x55   : > { %741 = vmatpush3.msra.mxu0 %v354_v6 }
  0x56   : > { %742 = vmatprep.subr.mxu0 %v941_v2 }
  0x57   : > { %311 = vadd.xlane.f32.xlu0 %v291_v58  ;;  %743 = vmatpush3.msra.mxu0 %v353_v7 }
  0x58   : > { %327 = vadd.xlane.f32.xlu1 %v299_v57  ;;  %744 = vmatprep.subr.mxu0 %v941_v2 }
  0x59   : > { %745 = vmatpush3.msra.mxu0 %v352_v8 }
  0x5a   : > { %746 = vmatprep.subr.mxu0 %v941_v2 }
  0x5b   : > { %313 = vadd.xlane.f32.xlu0 %v292_v60  ;;  %747 = vmatpush3.msra.mxu0 %v351_v9 }
  0x5c   : > { %329 = vadd.xlane.f32.xlu1 %v300_v59 }
  0x5f   : > { %315 = vadd.xlane.f32.xlu0 %v293_v62 }
  0x60   : > { %331 = vadd.xlane.f32.xlu1 %v301_v61 }
  0x63   : > { %317 = vadd.xlane.f32.xlu0 %v294_v0 }
  0x64   : > { %333 = vadd.xlane.f32.xlu1 %v302_v63 }
  0xd0   : > { %v304_v11 = vpop.xlane.xlu0 %303 }
  0xd1   : > { %v320_v10 = vpop.xlane.xlu1 %319  ;;  %v335_v37 = vmul.f32 0.00390625, %v304_v11 }
  0xd2   : > { %v343_v36 = vmul.f32 0.00390625, %v320_v10 }
  0xd3   : > { %v380_v54 = vrot.slane %v335_v37, %v379_v25 }
  0xd4   : > { %v306_v13 = vpop.xlane.xlu0 %305  ;;  %v433_v53 = vrot.slane %v343_v36, %v379_v25 }
  0xd5   : > { %v322_v12 = vpop.xlane.xlu1 %321  ;;  %v336_v34 = vmul.f32 0.00390625, %v306_v13 }
  0xd6   : > { %v344_v33 = vmul.f32 0.00390625, %v322_v12 }
  0xd7   : > { %v385_v50 = vrot.slane %v336_v34, %v384_v28 }
  0xd8   : > { %v308_v16 = vpop.xlane.xlu0 %307  ;;  %v437_v49 = vrot.slane %v344_v33, %v384_v28 }
  0xd9   : > { %v324_v15 = vpop.xlane.xlu1 %323  ;;  %v337_v39 = vmul.f32 0.00390625, %v308_v16  ;;  %v387_v3 = vsel %vm386_vm1, %v385_v50, %v380_v54 }
  0xda   : > { %v345_v38 = vmul.f32 0.00390625, %v324_v15  ;;  %v438_v2 = vsel %vm386_vm1, %v437_v49, %v433_v53 }
  0xdb   : > { %v392_v56 = vrot.slane %v337_v39, %v391_v29 }
  0xdc   : > { %v310_v20 = vpop.xlane.xlu0 %309  ;;  %v442_v55 = vrot.slane %v345_v38, %v391_v29 }
  0xdd   : > { %v326_v19 = vpop.xlane.xlu1 %325  ;;  %v338_v43 = vmul.f32 0.00390625, %v310_v20  ;;  %v394_v7 = vsel %vm393_vm2, %v392_v56, %v387_v3 }
  0xde   : > { %v346_v42 = vmul.f32 0.00390625, %v326_v19  ;;  %v443_v6 = vsel %vm393_vm2, %v442_v55, %v438_v2 }
  0xdf   : > { %v399_v60 = vrot.slane %v338_v43, %v398_v31 }
  0xe0   : > { %v312_v27 = vpop.xlane.xlu0 %311  ;;  %v447_v59 = vrot.slane %v346_v42, %v398_v31 }
  0xe1   : > { %v328_v26 = vpop.xlane.xlu1 %327  ;;  %v339_v46 = vmul.f32 0.00390625, %v312_v27  ;;  %v401_v13 = vsel %vm400_vm3, %v399_v60, %v394_v7  ;;  %v545_v27 = vld [vmem:[%s1137_s2] sm:$0xf] }
  0xe2   : > { %v347_v45 = vmul.f32 0.00390625, %v328_v26  ;;  %v448_v12 = vsel %vm400_vm3, %v447_v59, %v443_v6  ;;  %752 = vmatpush3.msk.msra.mxu1 %vm550_vm10, %v545_v27 }
  0xe3   : > { %v406_v0 = vrot.slane %v339_v46, %v405_v35 }
  0xe4   : > { %v314_v41 = vpop.xlane.xlu0 %313  ;;  %v452_v63 = vrot.slane %v347_v45, %v405_v35 }
  0xe5   : > { %v330_v40 = vpop.xlane.xlu1 %329  ;;  %v340_v52 = vmul.f32 0.00390625, %v314_v41  ;;  %v408_v17 = vsel %vm407_vm4, %v406_v0, %v401_v13 }
  0xe6   : > { %v348_v51 = vmul.f32 0.00390625, %v330_v40  ;;  %v453_v16 = vsel %vm407_vm4, %v452_v63, %v448_v12 }
  0xe7   : > { %v413_v5 = vrot.slane %v340_v52, %v412_v44 }
  0xe8   : > { %v316_v58 = vpop.xlane.xlu0 %315  ;;  %v457_v4 = vrot.slane %v348_v51, %v412_v44 }
  0xe9   : > { %v332_v57 = vpop.xlane.xlu1 %331  ;;  %v341_v62 = vmul.f32 0.00390625, %v316_v58  ;;  %v415_v19 = vsel %vm414_vm5, %v413_v5, %v408_v17 }
  0xea   : > { %v349_v61 = vmul.f32 0.00390625, %v332_v57  ;;  %v458_v18 = vsel %vm414_vm5, %v457_v4, %v453_v16 }
  0xeb   : > { %v420_v9 = vrot.slane %v341_v62, %v419_v47 }
  0xec   : > { %v462_v8 = vrot.slane %v349_v61, %v419_v47  ;;  %v318_v11 = vpop.xlane.xlu0 %317 }
  0xed   : > { %v334_v10 = vpop.xlane.xlu1 %333  ;;  %v342_v15 = vmul.f32 0.00390625, %v318_v11  ;;  %v422_v23 = vsel %vm421_vm6, %v420_v9, %v415_v19 }
  0xee   : > { %v350_v14 = vmul.f32 0.00390625, %v334_v10  ;;  %v463_v22 = vsel %vm421_vm6, %v462_v8, %v458_v18 }
  0xef   : > { %v427_v21 = vrot.slane %v342_v15, %v426_v1 }
  0xf0   : > { %v467_v20 = vrot.slane %v350_v14, %v426_v1 }
  0xf1   : > { %v429_v24 = vsel %vm428_vm7, %v427_v21, %v422_v23 }
  0xf2   : > { %v468_v25 = vsel %vm428_vm7, %v467_v20, %v463_v22 }
  0xf3   : > { %v470_v26 = vsel %vm469_vm8, %v468_v25, %v429_v24 }
  0xf4   : > { %749 = vmatmul.mubr.msk.f32.vlgmr.msra.gmra.mxu0 %vm471_vm9, %v470_v26 }
 0x1b4   : > { %v540_v28 = vpop.f32.mrf.mxu0 }
 0x1b5   : > { %v544_v29 = vmax.f32 %v540_v28, 0.0 }
 0x1b6   : > { %v750_v30 = vpop.f32.mrf.mxu0 }
 0x1b7   : > { %754 = vmatmul.mubr.msk.f32.vlgmr.msra.gmra.mxu1 %vm546_vm11, %v544_v29 }
 0x277   : > { %v620_v31 = vpop.f32.mrf.mxu1 }
 0x278   : > { %v716_v32 = vmul.f32 -1.442695, %v620_v31 }
 0x279   : > { %v755_v33 = vpop.f32.mrf.mxu1 }
 0x27a   : > { %824 = vpow2.f32 %v716_v32 }
 0x287   : > { %v825_v34 = vpop.eup %824 }
 0x288   : > { %v627_v35 = vadd.f32 1.0, %v825_v34 }
 0x28a   : > { %826 = vrcp.f32 %v627_v35 }
 0x297   : > { %v827_v36 = vpop.eup %826 }
 0x298   : > { %631 = vst.msk [vmem:[#allocation6] sm:$0x3] %vm630_vm12, %v827_v36 }
 0x299 PF: > { %p1102_p9 = scmp.eq.s32.totalorder %s704_s18, 1  ;;  %s943_s27 = smov [#allocation6]  }
 0x29a   : > { %s641_s15 = sshll.u32 %s943_s27, 4  ;;  %s642_s15 = int_to_ptr.vmem [resolvable:$true] %s641_s15 }
 0x29b   : > { %s856_s23 = scalar_lea.vmem %s642_s15, 32  ;;  %p863_p13 = scmp.lt.s32.totalorder %s642_s15, %s642_s15 }
 0x29c   : > { %p857_p10 = scmp.ne.s32.totalorder %s642_s15, %s856_s23  ;;  %p864_p0 = scmp.lt.s32.totalorder %s856_s23, %s856_s23 }
 0x29e   : > { %p858_p11 = pnand %p857_p10, %p1102_p9  ;;  %p865_p1 = por %p864_p0, %p863_p13 }
 0x2a0   : > { %p859_p12 = pneg %p858_p11 }
 0x2a2   : > { %p866_p2 = pnand %p865_p1, %p859_p12 }
 0x2a4   : > { %869 = shalt.err (!%p866_p2)
}
 0x2a5   : > { %759 = dma.vmem_to_hbm [thread:$0]  (%p1102_p9), %s642_s15, 32, %s1138_s3, [#allocation5]  }
 0x2a6   : > { %909 = dma.done.wait (%p1102_p9), [#allocation5], 32  }
 0x2a7   : > { %911 = vsyncadd (%p1102_p9), [#allocation5], 4294967264 }
 0x2a8 PF: > { %s17_s17 = sadd.s32 1, %s934_s17   ;;  %s1143_s12 = smov %s918_s13 }
 0x2a9   : > { %p14_p3 = scmp.ge.s32.totalorder %s17_s17, 4   ;;  %s1144_s13 = smov %s922_s14 }
 0x2aa   : > { %s1145_s14 = smov %s1015_s24  ;;  %s1146_s15 = smov %s930_s16 }
 0x2ab   : > { %s1147_s16 = smov %s1149_s19  ;;  %16 = sbr.rel (!%p14_p3) target bundleno = 5 (0x5), region = 78 }
 0x2b0   :  { %654 = vsyncpa [#allocation4], 1 }
 0x2b1   :  { %656 = vsyncpa [#allocation4 + $0x1], 1 }
 0x2b2   :  { %657 = vsyncpa [#allocation5], 1 }
 0x2b3   :  { %659 = vsyncpa [#allocation5 + $0x1], 1 }

// kernel: tpu_custom_call.1
= control target key start
LH: loop header
LB: loop body
LE: loop exit
PB: predicated region body
PF: predicated region fallthrough
CT: control target
= control target key end

     0   :  { %8 = vsyncpa [#allocation4], 0  ;;  %s1135_s0 = inlined_call_operand.hbm [shape: f32[2,64,256], index: 0, kind: input, shape index: {}]   ;;  %s1136_s1 = inlined_call_operand.vmem [shape: f32[64,4], index: 1, kind: input, shape index: {}]   ;;  %s1137_s2 = inlined_call_operand.vmem [shape: f32[4,64], index: 2, kind: input, shape index: {}]   ;;  %s1138_s3 = inlined_call_operand.hbm [shape: f32[2,64], index: 3, kind: output, shape index: {}]  }
   0x1   :  { %10 = vsyncpa [#allocation4 + $0x1], 0 }
   0x2   :  { %11 = vsyncpa [#allocation5], 0  ;;  %s964_s12 = smov 0   ;;  %s966_s13 = smov 0  }
   0x3   :  { %s968_s14 = smov 0   ;;  %s970_s15 = smov 0  }
   0x4   :  { %s972_s16 = smov 0   ;;  %s974_s17 = smov 0  }
   0x5 LB: > { %s704_s18 = sadd.s32 4294967295, %s934_s17   ;;  %s26_s19 = sadd.s32 1, %s930_s16  ;;  %s934_s17 = sphi %s974_s17, %s17_s17   ;;  %s930_s16 = sphi %s972_s16, %s1147_s16   ;;  %s926_s15 = sphi %s970_s15, %s1146_s15   ;;  %s922_s14 = sphi %s968_s14, %s1145_s14   ;;  %s918_s13 = sphi %s966_s13, %s1144_s13   ;;  %s914_s12 = sphi %s964_s12, %s1143_s12  }
   0x6   : > { %p27_p0 = scmp.ge.s32.totalorder %s26_s19, 2  ;;  %s38_s20 = sadd.s32 1, %s922_s14 }
   0x7   : > { %p45_p1 = scmp.ne.s32.totalorder %s922_s14, %s918_s13  ;;  %p46_p2 = scmp.eq.s32.totalorder %s934_s17, 0 }
   0x8   : > { %s1149_s19 = smov (%p27_p0, %s26_s19), 0  ;;  %p51_p4 = scmp.ne.s32.totalorder %s918_s13, %s914_s12 }
   0x9   : > { %p1000_p3 = por %p46_p2, %p45_p1  ;;  %s34_s22 = ssub.s32 %s930_s16, %s1149_s19 }
   0xa   : > { %p52_p5 = scmp.eq.s32.totalorder %s704_s18, 0  ;;  %p36_p6 = scmp.eq.s32.totalorder %s34_s22, 0 }
   0xb   : > { %p766_p8 = scmp.lt.s32.totalorder %s934_s17, 2  ;;  %s149_s25 = sand.u32 1, %s922_s14  }
   0xc   : > { %p1009_p7 = por %p52_p5, %p51_p4  ;;  %s708_s26 = sshll.u32 %s930_s16, 7 }
   0xd   : > { %s1015_s24 = scalar_select %p36_p6, %s922_s14, %s38_s20  }
   0xe   : > { %s707_s27 = sshll.u32 %s149_s25, 7  ;;  %s161_s30 = scalar_lea.hbm %s1135_s0, %s708_s26 }
   0xf   : > { %s153_s4 = scalar_lea.vmem [#allocation3], %s707_s27  ;;  %p1024_p9 = pnand %p766_p8, %p1000_p3 }
  0x10   : > { %s162_s5 = sshll.u32 %s153_s4, 4  ;;  %p709_p10 = scmp.ge.s32.totalorder %s934_s17, 1  ;;  %s163_s5 = int_to_ptr.vmem [resolvable:$true] %s162_s5 }
  0x11   : > { %s150_s7 = scalar_lea.sflag [#allocation4], %s149_s25  ;;  %p830_p11 = pneg %p1024_p9 }
  0x12   : > { %s841_s8 = scalar_lea.vmem %s163_s5, 2048  ;;  %s936_s9 = smov [#allocation3]  }
  0x13   : > { %p842_p12 = scmp.ne.s32.totalorder %s163_s5, %s841_s8  ;;  %s846_s10 = sshll.u32 %s936_s9, 4  ;;  %s847_s10 = int_to_ptr.vmem [resolvable:$false] %s846_s10 }
  0x14   : > { %s848_s11 = scalar_lea.vmem %s847_s10, 4096  ;;  %p849_p1 = scmp.lt.s32.totalorder %s163_s5, %s847_s10 }
  0x15   : > { %p844_p13 = pnand %p842_p12, %p830_p11  ;;  %p850_p2 = scmp.lt.s32.totalorder %s848_s11, %s841_s8 }
  0x17   : > { %p845_p0 = pneg %p844_p13  ;;  %p851_p3 = por %p850_p2, %p849_p1 }
  0x19   : > { %p852_p4 = pnand %p851_p3, %p845_p0 }
  0x1b   : > { %855 = shalt.err (!%p852_p4)
}
  0x1c   : > { %s937_s12 = smov 256   ;;  %s938_s20 = smov 128  }
  0x1d   : > { %s939_s21 = smov 8   ;;  %p170_p5 = scmp.lt.s32.totalorder %s934_s17, 3 }
  0x1e   : > { %765 = dma.hbm_to_vmem [thread:$0]  (!%p1024_p9), %s161_s30, 2048, %s163_s5, %s150_s7, %s937_s12, %s938_s20, %s939_s21  }
  0x1f   : > { %p171_p6 = pnand %p709_p10, %p170_p5 }
  0x20   : > { %s176_s22 = sand.u32 (!%p171_p6), 1, %s918_s13  }
  0x21   : > { %174 = sbr.rel (%p171_p6) target bundleno = 680 (0x2a8), region = 32  ;;  %s710_s25 = sshll.u32 (!%p171_p6), %s176_s22, 7 }
  0x22   : > { %s177_s26 = scalar_lea.sflag (!%p171_p6), [#allocation4], %s176_s22  ;;  %s1037_s27 = scalar_lea.vmem (!%p171_p6), [#allocation3], %s710_s25 }
  0x26   : > { %905 = dma.done.wait (%p1009_p7), %s177_s26, 2048  }
  0x27   : > { %907 = vsyncadd (%p1009_p7), %s177_s26, 4294965248  ;;  %p711_p8 = scmp.ne.s32.totalorder %s926_s15, 0 }
  0x29   : > { %202 = sbr.rel (%p711_p8) target bundleno = 55 (0x37), region = 40 }
  0x2e   : > { %v940_v0 = vmov 0.0  }
  0x2f   : > { %203 = vst [vmem:[#allocation2 + $0x30] sm:$0xff] %v940_v0  ;;  %204 = vst [vmem:[#allocation2] sm:$0xff] %v940_v0 }
  0x30   : > { %205 = vst [vmem:[#allocation2 + $0x58] sm:$0xff] %v940_v0  ;;  %206 = vst [vmem:[#allocation2 + $0x18] sm:$0xff] %v940_v0 }
  0x31   : > { %207 = vst [vmem:[#allocation2 + $0x50] sm:$0xff] %v940_v0  ;;  %208 = vst [vmem:[#allocation2 + $0x68] sm:$0xff] %v940_v0 }
  0x32   : > { %209 = vst [vmem:[#allocation2 + $0x8] sm:$0xff] %v940_v0  ;;  %210 = vst [vmem:[#allocation2 + $0x48] sm:$0xff] %v940_v0 }
  0x33   : > { %211 = vst [vmem:[#allocation2 + $0x40] sm:$0xff] %v940_v0  ;;  %212 = vst [vmem:[#allocation2 + $0x20] sm:$0xff] %v940_v0 }
  0x34   : > { %213 = vst [vmem:[#allocation2 + $0x10] sm:$0xff] %v940_v0  ;;  %214 = vst [vmem:[#allocation2 + $0x38] sm:$0xff] %v940_v0 }
  0x35   : > { %215 = vst [vmem:[#allocation2 + $0x60] sm:$0xff] %v940_v0  ;;  %216 = vst [vmem:[#allocation2 + $0x70] sm:$0xff] %v940_v0 }
  0x36   : > { %217 = vst [vmem:[#allocation2 + $0x78] sm:$0xff] %v940_v0  ;;  %218 = vst [vmem:[#allocation2 + $0x28] sm:$0xff] %v940_v0 }
  0x37 PF: > { %v219_v1 = vld [vmem:[#allocation2 + $0x30] sm:$0xff]  ;;  %v235_v2 = vld [vmem:[%s1037_s27] sm:$0xff]  ;;  %v236_v5 = vld [vmem:[%s1037_s27 + $0x8] sm:$0xff]  ;;  %p712_p7 = scmp.ne.s32.totalorder %s926_s15, 1 }
  0x38   : > { %v220_v3 = vld [vmem:[#allocation2] sm:$0xff]  ;;  %v251_v4 = vadd.f32 %v235_v2, %v219_v1  ;;  %v221_v6 = vld [vmem:[#allocation2 + $0x58] sm:$0xff]  ;;  %v237_v7 = vld [vmem:[%s1037_s27 + $0x10] sm:$0xff] }
  0x39   : > { %v252_v8 = vadd.f32 %v236_v5, %v220_v3  ;;  %v253_v9 = vadd.f32 %v237_v7, %v221_v6  ;;  %v222_v10 = vld [vmem:[#allocation2 + $0x18] sm:$0xff]  ;;  %v223_v12 = vld [vmem:[#allocation2 + $0x50] sm:$0xff]  ;;  %v239_v14 = vld [vmem:[%s1037_s27 + $0x20] sm:$0xff] }
  0x3a   : > { %v238_v11 = vld [vmem:[%s1037_s27 + $0x18] sm:$0xff]  ;;  %267 = vst [vmem:[#allocation2 + $0x30] sm:$0xff] %v251_v4  ;;  %v224_v15 = vld [vmem:[#allocation2 + $0x68] sm:$0xff]  ;;  %v255_v17 = vadd.f32 %v239_v14, %v223_v12  ;;  %v241_v20 = vld [vmem:[%s1037_s27 + $0x30] sm:$0xff] }
  0x3b   : > { %v254_v13 = vadd.f32 %v238_v11, %v222_v10  ;;  %v240_v16 = vld [vmem:[%s1037_s27 + $0x28] sm:$0xff]  ;;  %268 = vst [vmem:[#allocation2] sm:$0xff] %v252_v8  ;;  %269 = vst [vmem:[#allocation2 + $0x58] sm:$0xff] %v253_v9  ;;  %v242_v23 = vld [vmem:[%s1037_s27 + $0x38] sm:$0xff] }
  0x3c   : > { %v256_v18 = vadd.f32 %v240_v16, %v224_v15  ;;  %v225_v19 = vld [vmem:[#allocation2 + $0x8] sm:$0xff]  ;;  %v227_v24 = vld [vmem:[#allocation2 + $0x40] sm:$0xff]  ;;  %271 = vst [vmem:[#allocation2 + $0x50] sm:$0xff] %v255_v17  ;;  %v229_v30 = vld [vmem:[#allocation2 + $0x10] sm:$0xff] }
  0x3d   : > { %v226_v21 = vld [vmem:[#allocation2 + $0x48] sm:$0xff]  ;;  %270 = vst [vmem:[#allocation2 + $0x18] sm:$0xff] %v254_v13  ;;  %v257_v22 = vadd.f32 %v241_v20, %v225_v19  ;;  %v243_v25 = vld [vmem:[%s1037_s27 + $0x40] sm:$0xff]  ;;  %v245_v32 = vld [vmem:[%s1037_s27 + $0x50] sm:$0xff] }
  0x3e   : > { %272 = vst [vmem:[#allocation2 + $0x68] sm:$0xff] %v256_v18  ;;  %v258_v26 = vadd.f32 %v242_v23, %v226_v21  ;;  %v259_v27 = vadd.f32 %v243_v25, %v227_v24  ;;  %v228_v28 = vld [vmem:[#allocation2 + $0x20] sm:$0xff]  ;;  %v244_v29 = vld [vmem:[%s1037_s27 + $0x48] sm:$0xff]  ;;  %v230_v33 = vld [vmem:[#allocation2 + $0x38] sm:$0xff]  ;;  %v261_v35 = vadd.f32 %v245_v32, %v229_v30 }
  0x3f   : > { %273 = vst [vmem:[#allocation2 + $0x8] sm:$0xff] %v257_v22  ;;  %v260_v31 = vadd.f32 %v244_v29, %v228_v28  ;;  %v246_v34 = vld [vmem:[%s1037_s27 + $0x58] sm:$0xff]  ;;  %v231_v37 = vld [vmem:[#allocation2 + $0x60] sm:$0xff]  ;;  %v232_v39 = vld [vmem:[#allocation2 + $0x70] sm:$0xff] }
  0x40   : > { %274 = vst [vmem:[#allocation2 + $0x48] sm:$0xff] %v258_v26  ;;  %275 = vst [vmem:[#allocation2 + $0x40] sm:$0xff] %v259_v27  ;;  %v262_v36 = vadd.f32 %v246_v34, %v230_v33  ;;  %v247_v38 = vld [vmem:[%s1037_s27 + $0x60] sm:$0xff]  ;;  %v248_v41 = vld [vmem:[%s1037_s27 + $0x68] sm:$0xff] }
  0x41   : > { %276 = vst [vmem:[#allocation2 + $0x20] sm:$0xff] %v260_v31  ;;  %v263_v40 = vadd.f32 %v247_v38, %v231_v37  ;;  %v233_v42 = vld [vmem:[#allocation2 + $0x78] sm:$0xff]  ;;  %v249_v43 = vld [vmem:[%s1037_s27 + $0x70] sm:$0xff]  ;;  %277 = vst [vmem:[#allocation2 + $0x10] sm:$0xff] %v261_v35  ;;  %v264_v44 = vadd.f32 %v248_v41, %v232_v39  ;;  %286 = sbr.rel (%p712_p7) target bundleno = 665 (0x299), region = 44 }
  0x42   : > { %278 = vst [vmem:[#allocation2 + $0x38] sm:$0xff] %v262_v36  ;;  %v265_v45 = vadd.f32 %v249_v43, %v233_v42  ;;  %v234_v46 = vld [vmem:[#allocation2 + $0x28] sm:$0xff]  ;;  %v250_v47 = vld [vmem:[%s1037_s27 + $0x78] sm:$0xff] }
  0x43   : > { %279 = vst [vmem:[#allocation2 + $0x60] sm:$0xff] %v263_v40  ;;  %v266_v48 = vadd.f32 %v250_v47, %v234_v46  ;;  %280 = vst [vmem:[#allocation2 + $0x70] sm:$0xff] %v264_v44 }
  0x44   : > { %281 = vst [vmem:[#allocation2 + $0x78] sm:$0xff] %v265_v45 }
  0x45   : > { %282 = vst [vmem:[#allocation2 + $0x28] sm:$0xff] %v266_v48 }
  0x46   : > { %v287_v50 = vld [vmem:[#allocation2 + $0x30] sm:$0xff]  ;;  %v288_v52 = vld [vmem:[#allocation2] sm:$0xff]  ;;  %v289_v54 = vld [vmem:[#allocation2 + $0x58] sm:$0xff]  ;;  %v941_v2 = vmov 0.0   ;;  %vm942_vm0 = vmmov 0   ;;  %v375_v14 = vlaneseq  ;;  %vm386_vm1 = vcmask 130112  }
  0x47   : > { %v295_v49 = vld [vmem:[#allocation2 + $0x40] sm:$0xff]  ;;  %303 = vadd.xlane.f32.xlu0 %v287_v50  ;;  %v290_v56 = vld [vmem:[#allocation2 + $0x18] sm:$0xff]  ;;  %v291_v58 = vld [vmem:[#allocation2 + $0x50] sm:$0xff]  ;;  %732 = vmatprep.subr.mxu0 %v941_v2  ;;  %vm393_vm2 = vcmask 195712   ;;  %vm400_vm3 = vcmask 261312   ;;  %vm407_vm4 = vcmask 326912  }
  0x48   : > { %319 = vadd.xlane.f32.xlu1 %v295_v49  ;;  %v296_v51 = vld [vmem:[#allocation2 + $0x20] sm:$0xff]  ;;  %v297_v53 = vld [vmem:[#allocation2 + $0x10] sm:$0xff]  ;;  %v292_v60 = vld [vmem:[#allocation2 + $0x68] sm:$0xff]  ;;  %751 = vmatprep.subr.mxu1 %v941_v2  ;;  %v376_v17 = vand.u32 127, %v375_v14  ;;  %v378_v18 = vshrl.u32 %v375_v14, 7  ;;  %vm414_vm5 = vcmask 392512  }
  0x49   : > { %v298_v55 = vld [vmem:[#allocation2 + $0x38] sm:$0xff]  ;;  %v293_v62 = vld [vmem:[#allocation2 + $0x8] sm:$0xff]  ;;  %v357_v3 = vld [vmem:[%s1136_s1 + $0x30] sm:$0xff]  ;;  %748 = vmatprep.mubr.msk.f32.mxu0 %vm942_vm0, %v941_v2  ;;  %753 = vmatprep.mubr.msk.f32.mxu1 %vm942_vm0, %v941_v2  ;;  %vm421_vm6 = vcmask 458112   ;;  %vm428_vm7 = vcmask 523712   ;;  %vm469_vm8 = vcmask 1041409  }
  0x4a   : > { %v299_v57 = vld [vmem:[#allocation2 + $0x60] sm:$0xff]  ;;  %v300_v59 = vld [vmem:[#allocation2 + $0x70] sm:$0xff]  ;;  %v294_v0 = vld [vmem:[#allocation2 + $0x48] sm:$0xff]  ;;  %v381_v21 = vadd.s32 4294967288, %v376_v17  ;;  %v388_v22 = vadd.s32 4294967280, %v376_v17  ;;  %v395_v23 = vadd.s32 4294967272, %v376_v17  ;;  %v379_v25 = vsub.s32 %v376_v17, %v378_v18 }
  0x4b   : > { %305 = vadd.xlane.f32.xlu0 %v288_v52  ;;  %v301_v61 = vld [vmem:[#allocation2 + $0x78] sm:$0xff]  ;;  %v356_v4 = vld [vmem:[%s1136_s1 + $0x28] sm:$0xff]  ;;  %v355_v5 = vld [vmem:[%s1136_s1 + $0x20] sm:$0xff]  ;;  %v402_v24 = vadd.s32 4294967264, %v376_v17  ;;  %v409_v30 = vadd.s32 4294967256, %v376_v17  ;;  %v416_v32 = vadd.s32 4294967248, %v376_v17 }
  0x4c   : > { %321 = vadd.xlane.f32.xlu1 %v296_v51  ;;  %v302_v63 = vld [vmem:[#allocation2 + $0x28] sm:$0xff]  ;;  %v358_v1 = vld [vmem:[%s1136_s1 + $0x38] sm:$0xff]  ;;  %v353_v7 = vld [vmem:[%s1136_s1 + $0x10] sm:$0xff]  ;;  %v384_v28 = vsub.s32 %v381_v21, %v378_v18  ;;  %v391_v29 = vsub.s32 %v388_v22, %v378_v18  ;;  %v398_v31 = vsub.s32 %v395_v23, %v378_v18  ;;  %v423_v48 = vadd.s32 4294967240, %v376_v17 }
  0x4d   : > { %733 = vmatpush3.msra.mxu0 %v358_v1  ;;  %v354_v6 = vld [vmem:[%s1136_s1 + $0x18] sm:$0xff]  ;;  %v352_v8 = vld [vmem:[%s1136_s1 + $0x8] sm:$0xff]  ;;  %v351_v9 = vld [vmem:[%s1136_s1] sm:$0xff]  ;;  %v405_v35 = vsub.s32 %v402_v24, %v378_v18  ;;  %v412_v44 = vsub.s32 %v409_v30, %v378_v18  ;;  %v419_v47 = vsub.s32 %v416_v32, %v378_v18  ;;  %vm471_vm9 = vcmask 523264  }
  0x4e   : > { %734 = vmatprep.subr.mxu0 %v941_v2  ;;  %v426_v1 = vsub.s32 %v423_v48, %v378_v18  ;;  %vm550_vm10 = vcmask 1043456   ;;  %vm546_vm11 = vcmask 31744   ;;  %vm630_vm12 = vcmask 517120  }
  0x4f   : > { %307 = vadd.xlane.f32.xlu0 %v289_v54  ;;  %735 = vmatpush3.msra.mxu0 %v357_v3 }
  0x50   : > { %323 = vadd.xlane.f32.xlu1 %v297_v53  ;;  %736 = vmatprep.subr.mxu0 %v941_v2 }
  0x51   : > { %737 = vmatpush3.msra.mxu0 %v356_v4 }
  0x52   : > { %738 = vmatprep.subr.mxu0 %v941_v2 }
  0x53   : > { %309 = vadd.xlane.f32.xlu0 %v290_v56  ;;  %739 = vmatpush3.msra.mxu0 %v355_v5 }
  0x54   : > { %325 = vadd.xlane.f32.xlu1 %v298_v55  ;;  %740 = vmatprep.subr.mxu0 %v941_v2 }
  0x55   : > { %741 = vmatpush3.msra.mxu0 %v354_v6 }
  0x56   : > { %742 = vmatprep.subr.mxu0 %v941_v2 }
  0x57   : > { %311 = vadd.xlane.f32.xlu0 %v291_v58  ;;  %743 = vmatpush3.msra.mxu0 %v353_v7 }
  0x58   : > { %327 = vadd.xlane.f32.xlu1 %v299_v57  ;;  %744 = vmatprep.subr.mxu0 %v941_v2 }
  0x59   : > { %745 = vmatpush3.msra.mxu0 %v352_v8 }
  0x5a   : > { %746 = vmatprep.subr.mxu0 %v941_v2 }
  0x5b   : > { %313 = vadd.xlane.f32.xlu0 %v292_v60  ;;  %747 = vmatpush3.msra.mxu0 %v351_v9 }
  0x5c   : > { %329 = vadd.xlane.f32.xlu1 %v300_v59 }
  0x5f   : > { %315 = vadd.xlane.f32.xlu0 %v293_v62 }
  0x60   : > { %331 = vadd.xlane.f32.xlu1 %v301_v61 }
  0x63   : > { %317 = vadd.xlane.f32.xlu0 %v294_v0 }
  0x64   : > { %333 = vadd.xlane.f32.xlu1 %v302_v63 }
  0xd0   : > { %v304_v11 = vpop.xlane.xlu0 %303 }
  0xd1   : > { %v320_v10 = vpop.xlane.xlu1 %319  ;;  %v335_v37 = vmul.f32 0.00390625, %v304_v11 }
  0xd2   : > { %v343_v36 = vmul.f32 0.00390625, %v320_v10 }
  0xd3   : > { %v380_v54 = vrot.slane %v335_v37, %v379_v25 }
  0xd4   : > { %v306_v13 = vpop.xlane.xlu0 %305  ;;  %v433_v53 = vrot.slane %v343_v36, %v379_v25 }
  0xd5   : > { %v322_v12 = vpop.xlane.xlu1 %321  ;;  %v336_v34 = vmul.f32 0.00390625, %v306_v13 }
  0xd6   : > { %v344_v33 = vmul.f32 0.00390625, %v322_v12 }
  0xd7   : > { %v385_v50 = vrot.slane %v336_v34, %v384_v28 }
  0xd8   : > { %v308_v16 = vpop.xlane.xlu0 %307  ;;  %v437_v49 = vrot.slane %v344_v33, %v384_v28 }
  0xd9   : > { %v324_v15 = vpop.xlane.xlu1 %323  ;;  %v337_v39 = vmul.f32 0.00390625, %v308_v16  ;;  %v387_v3 = vsel %vm386_vm1, %v385_v50, %v380_v54 }
  0xda   : > { %v345_v38 = vmul.f32 0.00390625, %v324_v15  ;;  %v438_v2 = vsel %vm386_vm1, %v437_v49, %v433_v53 }
  0xdb   : > { %v392_v56 = vrot.slane %v337_v39, %v391_v29 }
  0xdc   : > { %v310_v20 = vpop.xlane.xlu0 %309  ;;  %v442_v55 = vrot.slane %v345_v38, %v391_v29 }
  0xdd   : > { %v326_v19 = vpop.xlane.xlu1 %325  ;;  %v338_v43 = vmul.f32 0.00390625, %v310_v20  ;;  %v394_v7 = vsel %vm393_vm2, %v392_v56, %v387_v3 }
  0xde   : > { %v346_v42 = vmul.f32 0.00390625, %v326_v19  ;;  %v443_v6 = vsel %vm393_vm2, %v442_v55, %v438_v2 }
  0xdf   : > { %v399_v60 = vrot.slane %v338_v43, %v398_v31 }
  0xe0   : > { %v312_v27 = vpop.xlane.xlu0 %311  ;;  %v447_v59 = vrot.slane %v346_v42, %v398_v31 }
  0xe1   : > { %v328_v26 = vpop.xlane.xlu1 %327  ;;  %v339_v46 = vmul.f32 0.00390625, %v312_v27  ;;  %v401_v13 = vsel %vm400_vm3, %v399_v60, %v394_v7  ;;  %v545_v27 = vld [vmem:[%s1137_s2] sm:$0xf] }
  0xe2   : > { %v347_v45 = vmul.f32 0.00390625, %v328_v26  ;;  %v448_v12 = vsel %vm400_vm3, %v447_v59, %v443_v6  ;;  %752 = vmatpush3.msk.msra.mxu1 %vm550_vm10, %v545_v27 }
  0xe3   : > { %v406_v0 = vrot.slane %v339_v46, %v405_v35 }
  0xe4   : > { %v314_v41 = vpop.xlane.xlu0 %313  ;;  %v452_v63 = vrot.slane %v347_v45, %v405_v35 }
  0xe5   : > { %v330_v40 = vpop.xlane.xlu1 %329  ;;  %v340_v52 = vmul.f32 0.00390625, %v314_v41  ;;  %v408_v17 = vsel %vm407_vm4, %v406_v0, %v401_v13 }
  0xe6   : > { %v348_v51 = vmul.f32 0.00390625, %v330_v40  ;;  %v453_v16 = vsel %vm407_vm4, %v452_v63, %v448_v12 }
  0xe7   : > { %v413_v5 = vrot.slane %v340_v52, %v412_v44 }
  0xe8   : > { %v316_v58 = vpop.xlane.xlu0 %315  ;;  %v457_v4 = vrot.slane %v348_v51, %v412_v44 }
  0xe9   : > { %v332_v57 = vpop.xlane.xlu1 %331  ;;  %v341_v62 = vmul.f32 0.00390625, %v316_v58  ;;  %v415_v19 = vsel %vm414_vm5, %v413_v5, %v408_v17 }
  0xea   : > { %v349_v61 = vmul.f32 0.00390625, %v332_v57  ;;  %v458_v18 = vsel %vm414_vm5, %v457_v4, %v453_v16 }
  0xeb   : > { %v420_v9 = vrot.slane %v341_v62, %v419_v47 }
  0xec   : > { %v462_v8 = vrot.slane %v349_v61, %v419_v47  ;;  %v318_v11 = vpop.xlane.xlu0 %317 }
  0xed   : > { %v334_v10 = vpop.xlane.xlu1 %333  ;;  %v342_v15 = vmul.f32 0.00390625, %v318_v11  ;;  %v422_v23 = vsel %vm421_vm6, %v420_v9, %v415_v19 }
  0xee   : > { %v350_v14 = vmul.f32 0.00390625, %v334_v10  ;;  %v463_v22 = vsel %vm421_vm6, %v462_v8, %v458_v18 }
  0xef   : > { %v427_v21 = vrot.slane %v342_v15, %v426_v1 }
  0xf0   : > { %v467_v20 = vrot.slane %v350_v14, %v426_v1 }
  0xf1   : > { %v429_v24 = vsel %vm428_vm7, %v427_v21, %v422_v23 }
  0xf2   : > { %v468_v25 = vsel %vm428_vm7, %v467_v20, %v463_v22 }
  0xf3   : > { %v470_v26 = vsel %vm469_vm8, %v468_v25, %v429_v24 }
  0xf4   : > { %749 = vmatmul.mubr.msk.f32.vlgmr.msra.gmra.mxu0 %vm471_vm9, %v470_v26 }
 0x1b4   : > { %v540_v28 = vpop.f32.mrf.mxu0 }
 0x1b5   : > { %v544_v29 = vmax.f32 %v540_v28, 0.0 }
 0x1b6   : > { %v750_v30 = vpop.f32.mrf.mxu0 }
 0x1b7   : > { %754 = vmatmul.mubr.msk.f32.vlgmr.msra.gmra.mxu1 %vm546_vm11, %v544_v29 }
 0x277   : > { %v620_v31 = vpop.f32.mrf.mxu1 }
 0x278   : > { %v716_v32 = vmul.f32 -1.442695, %v620_v31 }
 0x279   : > { %v755_v33 = vpop.f32.mrf.mxu1 }
 0x27a   : > { %824 = vpow2.f32 %v716_v32 }
 0x287   : > { %v825_v34 = vpop.eup %824 }
 0x288   : > { %v627_v35 = vadd.f32 1.0, %v825_v34 }
 0x28a   : > { %826 = vrcp.f32 %v627_v35 }
 0x297   : > { %v827_v36 = vpop.eup %826 }
 0x298   : > { %631 = vst.msk [vmem:[#allocation6] sm:$0x3] %vm630_vm12, %v827_v36 }
 0x299 PF: > { %p1102_p9 = scmp.eq.s32.totalorder %s704_s18, 1  ;;  %s943_s27 = smov [#allocation6]  }
 0x29a   : > { %s641_s15 = sshll.u32 %s943_s27, 4  ;;  %s642_s15 = int_to_ptr.vmem [resolvable:$true] %s641_s15 }
 0x29b   : > { %s856_s23 = scalar_lea.vmem %s642_s15, 32  ;;  %p863_p13 = scmp.lt.s32.totalorder %s642_s15, %s642_s15 }
 0x29c   : > { %p857_p10 = scmp.ne.s32.totalorder %s642_s15, %s856_s23  ;;  %p864_p0 = scmp.lt.s32.totalorder %s856_s23, %s856_s23 }
 0x29e   : > { %p858_p11 = pnand %p857_p10, %p1102_p9  ;;  %p865_p1 = por %p864_p0, %p863_p13 }
 0x2a0   : > { %p859_p12 = pneg %p858_p11 }
 0x2a2   : > { %p866_p2 = pnand %p865_p1, %p859_p12 }
 0x2a4   : > { %869 = shalt.err (!%p866_p2)
}
 0x2a5   : > { %759 = dma.vmem_to_hbm [thread:$0]  (%p1102_p9), %s642_s15, 32, %s1138_s3, [#allocation5]  }
 0x2a6   : > { %909 = dma.done.wait (%p1102_p9), [#allocation5], 32  }
 0x2a7   : > { %911 = vsyncadd (%p1102_p9), [#allocation5], 4294967264 }
 0x2a8 PF: > { %s17_s17 = sadd.s32 1, %s934_s17   ;;  %s1143_s12 = smov %s918_s13 }
 0x2a9   : > { %p14_p3 = scmp.ge.s32.totalorder %s17_s17, 4   ;;  %s1144_s13 = smov %s922_s14 }
 0x2aa   : > { %s1145_s14 = smov %s1015_s24  ;;  %s1146_s15 = smov %s930_s16 }
 0x2ab   : > { %s1147_s16 = smov %s1149_s19  ;;  %16 = sbr.rel (!%p14_p3) target bundleno = 5 (0x5), region = 78 }
 0x2b0   :  { %654 = vsyncpa [#allocation4], 1 }
 0x2b1   :  { %656 = vsyncpa [#allocation4 + $0x1], 1 }
 0x2b2   :  { %657 = vsyncpa [#allocation5], 1 }
 0x2b3   :  { %659 = vsyncpa [#allocation5 + $0x1], 1 }

</bundles_post_ra>
